<compile_context>
chip_gen: v5e
topology: v5e:2x2
jax: 0.10.0
libtpu: 0.0.40
codegen_flags: <defaults>
</compile_context>

<pallas_src>
import jax
import jax.numpy as jnp
from jax.experimental import pallas as pl
from jax.experimental.pallas import tpu as pltpu

NEG_SLOPE = 0.02   # nn.LeakyReLU(negative_slope)
EPS = 1e-5         # nn.BatchNorm1d eps
KSIZE = 3


def _leaky(v):
    return jnp.where(v >= 0.0, v, NEG_SLOPE * v)


def _leaky_deconv_tile(x_ref, lh_ref, rh_ref, w_ref):
    """LeakyReLU -> ConvTranspose1d(k=3, s=1, p=1) on one (C, TL) tile.

    x_ref : (C, TL)    input tile (L on the lane axis)
    lh_ref: (C, 1)     left-neighbor column of this tile (zero at the left edge)
    rh_ref: (C, 1)     right-neighbor column of this tile (zero at the right edge)
    w_ref : (C, K*C)   folded weight: W_cat[co, k*C + ci] = W[ci, co, k]
    returns (C, TL) float32 un-normalized conv output.
    """
    tl = x_ref.shape[1]
    a = _leaky(x_ref[...].astype(jnp.float32))            # (C, TL)  tap k = 1
    al = _leaky(lh_ref[...].astype(jnp.float32))           # (C, 1)
    ar = _leaky(rh_ref[...].astype(jnp.float32))           # (C, 1)

    # y[co, l] = sum_k sum_ci W[ci, co, k] * a[ci, l + 1 - k]
    # Build the three shifted windows (staying lane-aligned at width TL) and stack
    # them along the contraction dim (k-major, matching w_ref's column order) so
    # the three taps become ONE MXU dot with lane dim = TL.
    a_k0 = jnp.concatenate([a[:, 1:], ar], axis=1)          # a[ci, l + 1]
    a_k2 = jnp.concatenate([al, a[:, :tl - 1]], axis=1)     # a[ci, l - 1]
    a_cat = jnp.concatenate([a_k0, a, a_k2], axis=0)        # (3C, TL)
    return jnp.dot(w_ref[...], a_cat, preferred_element_type=jnp.float32)


def _stats_kernel(x_ref, lh_ref, rh_ref, w_ref, st_ref):
    """Partial BatchNorm statistics of the conv output for one tile (no y writeback)."""
    y = _leaky_deconv_tile(x_ref, lh_ref, rh_ref, w_ref)
    st_ref[...] = jnp.concatenate(
        [jnp.sum(y, axis=1, keepdims=True),
         jnp.sum(y * y, axis=1, keepdims=True)], axis=1)     # (C, 2)


def _apply_kernel(x_ref, lh_ref, rh_ref, w_ref, scale_ref, shift_ref, o_ref):
    """Recompute conv and apply folded BN:  out = y * scale + shift."""
    y = _leaky_deconv_tile(x_ref, lh_ref, rh_ref, w_ref)
    o_ref[...] = (y * scale_ref[...] + shift_ref[...]).astype(o_ref.dtype)


def _pick_tile_l(L):
    """Largest convenient L tile that divides L (128-multiple when tiling is needed)."""
    if L <= 2048:
        return L
    for cand in (2048, 1024, 512, 256, 128):
        if L % cand == 0:
            return cand
    return L  # fallback: no L tiling


def res_block_deconv_part(x, weight, gamma, beta):
    """x: (N, C, L) (PyTorch NCL). weight: (C_in, C_out, K) ConvTranspose1d. gamma/beta: (C,)."""
    N, C, L = x.shape
    K = weight.shape[-1]
    tl = _pick_tile_l(L)
    nj = L // tl

    # Fold the K taps into one (C_out, K*C_in) matmul operand (hoisted, done once).
    w_cat = jnp.transpose(weight, (2, 0, 1)).reshape(K * C, C).T.astype(jnp.float32)

    # Tiny per-tile halo columns: left/right neighbor column of each L tile
    # (zeros at the sequence edges). Shapes (N, nj, C, 1) -> negligible HBM traffic.
    zero = jnp.zeros((N, C, 1), x.dtype)
    if nj > 1:
        lcols = x[:, :, tl - 1:L - 1:tl]                    # (N, C, nj-1)
        rcols = x[:, :, tl:L:tl]                            # (N, C, nj-1)
        halo_l = jnp.concatenate([zero, lcols], axis=2)     # (N, C, nj)
        halo_r = jnp.concatenate([rcols, zero], axis=2)
    else:
        halo_l, halo_r = zero, zero
    halo_l = jnp.transpose(halo_l, (0, 2, 1))[..., None]    # (N, nj, C, 1)
    halo_r = jnp.transpose(halo_r, (0, 2, 1))[..., None]

    cparams = pltpu.CompilerParams(
        dimension_semantics=("parallel", "parallel"),        # megacore split on v7x
        vmem_limit_bytes=64 * 1024 * 1024)

    x_spec = pl.BlockSpec((None, C, tl), lambda n, j: (n, 0, j))
    halo_spec = pl.BlockSpec((None, None, C, 1), lambda n, j: (n, j, 0, 0))
    w_spec = pl.BlockSpec((C, K * C), lambda n, j: (0, 0))

    # Pass 1: conv + partial BN statistics only (full tensor is NOT written back).
    partial = pl.pallas_call(
        _stats_kernel,
        out_shape=jax.ShapeDtypeStruct((N, nj, C, 2), jnp.float32),
        grid=(N, nj),
        in_specs=[x_spec, halo_spec, halo_spec, w_spec],
        out_specs=pl.BlockSpec((None, None, C, 2), lambda n, j: (n, j, 0, 0)),
        compiler_params=cparams,
    )(x, halo_l, halo_r, w_cat)

    # Tiny O(C) glue: reduce partial stats, fold BN stats + affine into scale/shift.
    sums = jnp.sum(partial, axis=(0, 1))                    # (C, 2)
    cnt = float(N * L)
    mean = sums[:, 0] / cnt
    var = sums[:, 1] / cnt - mean * mean                    # biased var (training-mode BN)
    inv = jax.lax.rsqrt(var + EPS)
    g32 = gamma.astype(jnp.float32)
    scale = (g32 * inv).reshape(C, 1)
    shift = (beta.astype(jnp.float32) - mean * g32 * inv).reshape(C, 1)

    # Pass 2: recompute conv (memory-bound, small C -> MXU work is free) + normalize.
    out = pl.pallas_call(
        _apply_kernel,
        out_shape=jax.ShapeDtypeStruct((N, C, L), x.dtype),
        grid=(N, nj),
        in_specs=[x_spec, halo_spec, halo_spec, w_spec,
                  pl.BlockSpec((C, 1), lambda n, j: (0, 0)),
                  pl.BlockSpec((C, 1), lambda n, j: (0, 0))],
        out_specs=x_spec,
        compiler_params=cparams,
    )(x, halo_l, halo_r, w_cat, scale, shift)
    # TODO(synk): PyTorch training-mode BatchNorm1d also updates running_mean/running_var
    # buffers; only the forward output is produced here.
    return out


def _reference(x, weight, gamma, beta):
    """Pure-JAX reference matching the PyTorch forward (training-mode BatchNorm)."""
    a = jnp.where(x >= 0.0, x, NEG_SLOPE * x)
    # ConvTranspose1d(stride=1, padding=1) == Conv1d with swapped in/out channels
    # and flipped taps, same padding.
    w_conv = jnp.flip(jnp.transpose(weight, (1, 0, 2)), axis=2)   # (C_out, C_in, K)
    y = jax.lax.conv_general_dilated(
        a, w_conv, window_strides=(1,), padding=((1, 1),),
        dimension_numbers=("NCH", "OIH", "NCH"))
    mean = y.mean(axis=(0, 2), keepdims=True)
    var = ((y - mean) ** 2).mean(axis=(0, 2), keepdims=True)
    yhat = (y - mean) / jnp.sqrt(var + EPS)
    return yhat * gamma[None, :, None] + beta[None, :, None]


if __name__ == "__main__":
    key = jax.random.PRNGKey(0)
    k1, k2, k3, k4 = jax.random.split(key, 4)
    N, C, L = 2, 4, 16

    x = jax.random.normal(k1, (N, C, L), jnp.float32)
    # ConvTranspose1d(channels, channels, kernel_size=3, bias=False) weight: (C_in, C_out, K)
    weight = 0.3 * jax.random.normal(k2, (C, C, KSIZE), jnp.float32)
    # BatchNorm1d affine params (perturbed from 1/0 defaults to exercise the math)
    gamma = jnp.ones((C,), jnp.float32) + 0.1 * jax.random.normal(k3, (C,), jnp.float32)
    beta = 0.1 * jax.random.normal(k4, (C,), jnp.float32)

    fwd = jax.jit(res_block_deconv_part)
    out = fwd(x, weight, gamma, beta)
    out = jax.block_until_ready(out)

    ref = _reference(x, weight, gamma, beta)
    assert out.shape == (N, C, L)
    assert jnp.allclose(out, ref, atol=1e-4, rtol=1e-4), float(jnp.max(jnp.abs(out - ref)))
    print("KERNEL_OK")
</pallas_src>

<mosaic_0001>
module attributes {stable_mosaic.version = 11 : i64} {
  func.func @_stats_kernel(%arg0: i32, %arg1: i32, %arg2: memref<1x4x16xf32, #tpu.memory_space<vmem>>, %arg3: memref<1x1x4x1xf32, #tpu.memory_space<vmem>>, %arg4: memref<1x1x4x1xf32, #tpu.memory_space<vmem>>, %arg5: memref<4x12xf32, #tpu.memory_space<vmem>>, %arg6: memref<1x1x4x2xf32, #tpu.memory_space<vmem>>) attributes {dimension_semantics = [#tpu.dimension_semantics<parallel>, #tpu.dimension_semantics<parallel>], iteration_bounds = array<i64: 2, 1>, scalar_prefetch = 0 : i64, scratch_operands = 0 : i64, tpu.core_type = #tpu.core_type<tc>, window_params = [{transform_indices = @transform_0, window_bounds = array<i64: 1, 4, 16>}, {transform_indices = @transform_1, window_bounds = array<i64: 1, 1, 4, 1>}, {transform_indices = @transform_2, window_bounds = array<i64: 1, 1, 4, 1>}, {pipeline_mode = #tpu.pipeline_mode<synchronous>, transform_indices = @transform_3, window_bounds = array<i64: 4, 12>}, {transform_indices = @transform_4, window_bounds = array<i64: 1, 1, 4, 2>}]} {
    %c0 = arith.constant 0 : index
    %c0_0 = arith.constant 0 : index
    %c0_1 = arith.constant 0 : index
    %0 = vector.load %arg2[%c0, %c0_0, %c0_1] : memref<1x4x16xf32, #tpu.memory_space<vmem>>, vector<1x4x16xf32>
    %1 = vector.shape_cast %0 : vector<1x4x16xf32> to vector<4x16xf32>
    %cst = arith.constant 0.000000e+00 : f32
    %2 = vector.broadcast %cst : f32 to vector<4x16xf32>
    %3 = arith.cmpf oge, %1, %2 : vector<4x16xf32>
    %cst_2 = arith.constant 2.000000e-02 : f32
    %4 = vector.broadcast %cst_2 : f32 to vector<4x16xf32>
    %5 = arith.mulf %4, %1 : vector<4x16xf32>
    %6 = arith.select %3, %1, %5 : vector<4x16xi1>, vector<4x16xf32>
    %c0_3 = arith.constant 0 : index
    %c0_4 = arith.constant 0 : index
    %c0_5 = arith.constant 0 : index
    %c0_6 = arith.constant 0 : index
    %7 = vector.load %arg3[%c0_3, %c0_4, %c0_5, %c0_6] : memref<1x1x4x1xf32, #tpu.memory_space<vmem>>, vector<1x1x4x1xf32>
    %8 = vector.shape_cast %7 : vector<1x1x4x1xf32> to vector<4x1xf32>
    %cst_7 = arith.constant 0.000000e+00 : f32
    %9 = vector.broadcast %cst_7 : f32 to vector<4x1xf32>
    %10 = arith.cmpf oge, %8, %9 : vector<4x1xf32>
    %cst_8 = arith.constant 2.000000e-02 : f32
    %11 = vector.broadcast %cst_8 : f32 to vector<4x1xf32>
    %12 = arith.mulf %11, %8 : vector<4x1xf32>
    %13 = arith.select %10, %8, %12 : vector<4x1xi1>, vector<4x1xf32>
    %c0_9 = arith.constant 0 : index
    %c0_10 = arith.constant 0 : index
    %c0_11 = arith.constant 0 : index
    %c0_12 = arith.constant 0 : index
    %14 = vector.load %arg4[%c0_9, %c0_10, %c0_11, %c0_12] : memref<1x1x4x1xf32, #tpu.memory_space<vmem>>, vector<1x1x4x1xf32>
    %15 = vector.shape_cast %14 : vector<1x1x4x1xf32> to vector<4x1xf32>
    %cst_13 = arith.constant 0.000000e+00 : f32
    %16 = vector.broadcast %cst_13 : f32 to vector<4x1xf32>
    %17 = arith.cmpf oge, %15, %16 : vector<4x1xf32>
    %cst_14 = arith.constant 2.000000e-02 : f32
    %18 = vector.broadcast %cst_14 : f32 to vector<4x1xf32>
    %19 = arith.mulf %18, %15 : vector<4x1xf32>
    %20 = arith.select %17, %15, %19 : vector<4x1xi1>, vector<4x1xf32>
    %21 = vector.extract_strided_slice %6 {offsets = [0, 1], sizes = [4, 15], strides = [1, 1]} : vector<4x16xf32> to vector<4x15xf32>
    %22 = tpu.concatenate %21, %20 in 1 : vector<4x15xf32>, vector<4x1xf32> -> vector<4x16xf32>
    %23 = vector.extract_strided_slice %6 {offsets = [0, 0], sizes = [4, 15], strides = [1, 1]} : vector<4x16xf32> to vector<4x15xf32>
    %24 = tpu.concatenate %13, %23 in 1 : vector<4x1xf32>, vector<4x15xf32> -> vector<4x16xf32>
    %25 = tpu.concatenate %22, %6, %24 in 0 : vector<4x16xf32>, vector<4x16xf32>, vector<4x16xf32> -> vector<12x16xf32>
    %c0_15 = arith.constant 0 : index
    %c0_16 = arith.constant 0 : index
    %26 = vector.load %arg5[%c0_15, %c0_16] : memref<4x12xf32, #tpu.memory_space<vmem>>, vector<4x12xf32>
    %cst_17 = arith.constant dense<0.000000e+00> : vector<4x16xf32>
    %27 = tpu.matmul %26, %25, %cst_17 {dimension_numbers = #tpu.dot_dimension_numbers<[1], [0], [0], [1], [0, 0, 1, 1], [], []>} : vector<4x12xf32>, vector<12x16xf32>, vector<4x16xf32> -> vector<4x16xf32>
    %cst_18 = arith.constant dense<0.000000e+00> : vector<4xf32>
    %28 = vector.multi_reduction <add>, %27, %cst_18 [1] : vector<4x16xf32> to vector<4xf32>
    %29 = vector.shape_cast %28 : vector<4xf32> to vector<4x1xf32>
    %30 = arith.mulf %27, %27 : vector<4x16xf32>
    %cst_19 = arith.constant dense<0.000000e+00> : vector<4xf32>
    %31 = vector.multi_reduction <add>, %30, %cst_19 [1] : vector<4x16xf32> to vector<4xf32>
    %32 = vector.shape_cast %31 : vector<4xf32> to vector<4x1xf32>
    %33 = tpu.concatenate %29, %32 in 1 : vector<4x1xf32>, vector<4x1xf32> -> vector<4x2xf32>
    %c0_20 = arith.constant 0 : index
    %c0_21 = arith.constant 0 : index
    %c0_22 = arith.constant 0 : index
    %c0_23 = arith.constant 0 : index
    %34 = vector.load %arg6[%c0_20, %c0_21, %c0_22, %c0_23] : memref<1x1x4x2xf32, #tpu.memory_space<vmem>>, vector<1x1x4x2xf32>
    %35 = vector.shape_cast %34 : vector<1x1x4x2xf32> to vector<4x2xf32>
    %36 = vector.shape_cast %33 : vector<4x2xf32> to vector<1x1x4x2xf32>
    tpu.vector_store %arg6[%c0_20, %c0_21, %c0_22, %c0_23], %36 {strides = array<i32>} : memref<1x1x4x2xf32, #tpu.memory_space<vmem>>, vector<1x1x4x2xf32>,
    return
  }
  func.func @transform_0(%arg0: i32, %arg1: i32) -> (i32, i32, i32) {
    %c0_i32 = arith.constant 0 : i32
    %c0_i32_0 = arith.constant 0 : i32
    return %arg0, %c0_i32, %arg1 : i32, i32, i32
  }
  func.func @transform_1(%arg0: i32, %arg1: i32) -> (i32, i32, i32, i32) {
    %c0_i32 = arith.constant 0 : i32
    %c0_i32_0 = arith.constant 0 : i32
    %c0_i32_1 = arith.constant 0 : i32
    return %arg0, %arg1, %c0_i32, %c0_i32_0 : i32, i32, i32, i32
  }
  func.func @transform_2(%arg0: i32, %arg1: i32) -> (i32, i32, i32, i32) {
    %c0_i32 = arith.constant 0 : i32
    %c0_i32_0 = arith.constant 0 : i32
    %c0_i32_1 = arith.constant 0 : i32
    return %arg0, %arg1, %c0_i32, %c0_i32_0 : i32, i32, i32, i32
  }
  func.func @transform_3(%arg0: i32, %arg1: i32) -> (i32, i32) {
    %c0_i32 = arith.constant 0 : i32
    %c0_i32_0 = arith.constant 0 : i32
    %c0_i32_1 = arith.constant 0 : i32
    return %c0_i32, %c0_i32_0 : i32, i32
  }
  func.func @transform_4(%arg0: i32, %arg1: i32) -> (i32, i32, i32, i32) {
    %c0_i32 = arith.constant 0 : i32
    %c0_i32_0 = arith.constant 0 : i32
    %c0_i32_1 = arith.constant 0 : i32
    return %arg0, %arg1, %c0_i32, %c0_i32_0 : i32, i32, i32, i32
  }
}

module attributes {stable_mosaic.version = 11 : i64} {
  func.func @_apply_kernel(%arg0: i32, %arg1: i32, %arg2: memref<1x4x16xf32, #tpu.memory_space<vmem>>, %arg3: memref<1x1x4x1xf32, #tpu.memory_space<vmem>>, %arg4: memref<1x1x4x1xf32, #tpu.memory_space<vmem>>, %arg5: memref<4x12xf32, #tpu.memory_space<vmem>>, %arg6: memref<4x1xf32, #tpu.memory_space<vmem>>, %arg7: memref<4x1xf32, #tpu.memory_space<vmem>>, %arg8: memref<1x4x16xf32, #tpu.memory_space<vmem>>) attributes {dimension_semantics = [#tpu.dimension_semantics<parallel>, #tpu.dimension_semantics<parallel>], iteration_bounds = array<i64: 2, 1>, scalar_prefetch = 0 : i64, scratch_operands = 0 : i64, tpu.core_type = #tpu.core_type<tc>, window_params = [{transform_indices = @transform_0, window_bounds = array<i64: 1, 4, 16>}, {transform_indices = @transform_1, window_bounds = array<i64: 1, 1, 4, 1>}, {transform_indices = @transform_2, window_bounds = array<i64: 1, 1, 4, 1>}, {pipeline_mode = #tpu.pipeline_mode<synchronous>, transform_indices = @transform_3, window_bounds = array<i64: 4, 12>}, {pipeline_mode = #tpu.pipeline_mode<synchronous>, transform_indices = @transform_4, window_bounds = array<i64: 4, 1>}, {pipeline_mode = #tpu.pipeline_mode<synchronous>, transform_indices = @transform_5, window_bounds = array<i64: 4, 1>}, {transform_indices = @transform_6, window_bounds = array<i64: 1, 4, 16>}]} {
    %c0 = arith.constant 0 : index
    %c0_0 = arith.constant 0 : index
    %c0_1 = arith.constant 0 : index
    %0 = vector.load %arg2[%c0, %c0_0, %c0_1] : memref<1x4x16xf32, #tpu.memory_space<vmem>>, vector<1x4x16xf32>
    %1 = vector.shape_cast %0 : vector<1x4x16xf32> to vector<4x16xf32>
    %cst = arith.constant 0.000000e+00 : f32
    %2 = vector.broadcast %cst : f32 to vector<4x16xf32>
    %3 = arith.cmpf oge, %1, %2 : vector<4x16xf32>
    %cst_2 = arith.constant 2.000000e-02 : f32
    %4 = vector.broadcast %cst_2 : f32 to vector<4x16xf32>
    %5 = arith.mulf %4, %1 : vector<4x16xf32>
    %6 = arith.select %3, %1, %5 : vector<4x16xi1>, vector<4x16xf32>
    %c0_3 = arith.constant 0 : index
    %c0_4 = arith.constant 0 : index
    %c0_5 = arith.constant 0 : index
    %c0_6 = arith.constant 0 : index
    %7 = vector.load %arg3[%c0_3, %c0_4, %c0_5, %c0_6] : memref<1x1x4x1xf32, #tpu.memory_space<vmem>>, vector<1x1x4x1xf32>
    %8 = vector.shape_cast %7 : vector<1x1x4x1xf32> to vector<4x1xf32>
    %cst_7 = arith.constant 0.000000e+00 : f32
    %9 = vector.broadcast %cst_7 : f32 to vector<4x1xf32>
    %10 = arith.cmpf oge, %8, %9 : vector<4x1xf32>
    %cst_8 = arith.constant 2.000000e-02 : f32
    %11 = vector.broadcast %cst_8 : f32 to vector<4x1xf32>
    %12 = arith.mulf %11, %8 : vector<4x1xf32>
    %13 = arith.select %10, %8, %12 : vector<4x1xi1>, vector<4x1xf32>
    %c0_9 = arith.constant 0 : index
    %c0_10 = arith.constant 0 : index
    %c0_11 = arith.constant 0 : index
    %c0_12 = arith.constant 0 : index
    %14 = vector.load %arg4[%c0_9, %c0_10, %c0_11, %c0_12] : memref<1x1x4x1xf32, #tpu.memory_space<vmem>>, vector<1x1x4x1xf32>
    %15 = vector.shape_cast %14 : vector<1x1x4x1xf32> to vector<4x1xf32>
    %cst_13 = arith.constant 0.000000e+00 : f32
    %16 = vector.broadcast %cst_13 : f32 to vector<4x1xf32>
    %17 = arith.cmpf oge, %15, %16 : vector<4x1xf32>
    %cst_14 = arith.constant 2.000000e-02 : f32
    %18 = vector.broadcast %cst_14 : f32 to vector<4x1xf32>
    %19 = arith.mulf %18, %15 : vector<4x1xf32>
    %20 = arith.select %17, %15, %19 : vector<4x1xi1>, vector<4x1xf32>
    %21 = vector.extract_strided_slice %6 {offsets = [0, 1], sizes = [4, 15], strides = [1, 1]} : vector<4x16xf32> to vector<4x15xf32>
    %22 = tpu.concatenate %21, %20 in 1 : vector<4x15xf32>, vector<4x1xf32> -> vector<4x16xf32>
    %23 = vector.extract_strided_slice %6 {offsets = [0, 0], sizes = [4, 15], strides = [1, 1]} : vector<4x16xf32> to vector<4x15xf32>
    %24 = tpu.concatenate %13, %23 in 1 : vector<4x1xf32>, vector<4x15xf32> -> vector<4x16xf32>
    %25 = tpu.concatenate %22, %6, %24 in 0 : vector<4x16xf32>, vector<4x16xf32>, vector<4x16xf32> -> vector<12x16xf32>
    %c0_15 = arith.constant 0 : index
    %c0_16 = arith.constant 0 : index
    %26 = vector.load %arg5[%c0_15, %c0_16] : memref<4x12xf32, #tpu.memory_space<vmem>>, vector<4x12xf32>
    %cst_17 = arith.constant dense<0.000000e+00> : vector<4x16xf32>
    %27 = tpu.matmul %26, %25, %cst_17 {dimension_numbers = #tpu.dot_dimension_numbers<[1], [0], [0], [1], [0, 0, 1, 1], [], []>} : vector<4x12xf32>, vector<12x16xf32>, vector<4x16xf32> -> vector<4x16xf32>
    %c0_18 = arith.constant 0 : index
    %c0_19 = arith.constant 0 : index
    %28 = vector.load %arg6[%c0_18, %c0_19] : memref<4x1xf32, #tpu.memory_space<vmem>>, vector<4x1xf32>
    %29 = vector.broadcast %28 : vector<4x1xf32> to vector<4x16xf32>
    %30 = arith.mulf %27, %29 : vector<4x16xf32>
    %c0_20 = arith.constant 0 : index
    %c0_21 = arith.constant 0 : index
    %31 = vector.load %arg7[%c0_20, %c0_21] : memref<4x1xf32, #tpu.memory_space<vmem>>, vector<4x1xf32>
    %32 = vector.broadcast %31 : vector<4x1xf32> to vector<4x16xf32>
    %33 = arith.addf %30, %32 : vector<4x16xf32>
    %c0_22 = arith.constant 0 : index
    %c0_23 = arith.constant 0 : index
    %c0_24 = arith.constant 0 : index
    %34 = vector.load %arg8[%c0_22, %c0_23, %c0_24] : memref<1x4x16xf32, #tpu.memory_space<vmem>>, vector<1x4x16xf32>
    %35 = vector.shape_cast %34 : vector<1x4x16xf32> to vector<4x16xf32>
    %36 = vector.shape_cast %33 : vector<4x16xf32> to vector<1x4x16xf32>
    tpu.vector_store %arg8[%c0_22, %c0_23, %c0_24], %36 {strides = array<i32>} : memref<1x4x16xf32, #tpu.memory_space<vmem>>, vector<1x4x16xf32>,
    return
  }
  func.func @transform_0(%arg0: i32, %arg1: i32) -> (i32, i32, i32) {
    %c0_i32 = arith.constant 0 : i32
    %c0_i32_0 = arith.constant 0 : i32
    return %arg0, %c0_i32, %arg1 : i32, i32, i32
  }
  func.func @transform_1(%arg0: i32, %arg1: i32) -> (i32, i32, i32, i32) {
    %c0_i32 = arith.constant 0 : i32
    %c0_i32_0 = arith.constant 0 : i32
    %c0_i32_1 = arith.constant 0 : i32
    return %arg0, %arg1, %c0_i32, %c0_i32_0 : i32, i32, i32, i32
  }
  func.func @transform_2(%arg0: i32, %arg1: i32) -> (i32, i32, i32, i32) {
    %c0_i32 = arith.constant 0 : i32
    %c0_i32_0 = arith.constant 0 : i32
    %c0_i32_1 = arith.constant 0 : i32
    return %arg0, %arg1, %c0_i32, %c0_i32_0 : i32, i32, i32, i32
  }
  func.func @transform_3(%arg0: i32, %arg1: i32) -> (i32, i32) {
    %c0_i32 = arith.constant 0 : i32
    %c0_i32_0 = arith.constant 0 : i32
    %c0_i32_1 = arith.constant 0 : i32
    return %c0_i32, %c0_i32_0 : i32, i32
  }
  func.func @transform_4(%arg0: i32, %arg1: i32) -> (i32, i32) {
    %c0_i32 = arith.constant 0 : i32
    %c0_i32_0 = arith.constant 0 : i32
    %c0_i32_1 = arith.constant 0 : i32
    return %c0_i32, %c0_i32_0 : i32, i32
  }
  func.func @transform_5(%arg0: i32, %arg1: i32) -> (i32, i32) {
    %c0_i32 = arith.constant 0 : i32
    %c0_i32_0 = arith.constant 0 : i32
    %c0_i32_1 = arith.constant 0 : i32
    return %c0_i32, %c0_i32_0 : i32, i32
  }
  func.func @transform_6(%arg0: i32, %arg1: i32) -> (i32, i32, i32) {
    %c0_i32 = arith.constant 0 : i32
    %c0_i32_0 = arith.constant 0 : i32
    return %arg0, %c0_i32, %arg1 : i32, i32, i32
  }
}

</mosaic_0001>

<bundles_post_ra>
// kernel: res_block_deconv_part.2
= control target key start
LH: loop header
LB: loop body
LE: loop exit
PB: predicated region body
PF: predicated region fallthrough
CT: control target
= control target key end

     0   :  { %s546_s15 = smov 0   ;;  %s548_s16 = smov 0   ;;  %s596_s0 = inlined_call_operand.vmem [shape: f32[2,4,16], index: 0, kind: input, shape index: {}]   ;;  %s597_s1 = inlined_call_operand.vmem [shape: f32[2,1,4,1], index: 1, kind: input, shape index: {}, may-alias: {1,2}]   ;;  %s598_s2 = inlined_call_operand.vmem [shape: f32[2,1,4,1], index: 2, kind: input, shape index: {}, may-alias: {1,2}]   ;;  %s599_s3 = inlined_call_operand.vmem [shape: f32[4,12], index: 3, kind: input, shape index: {}]   ;;  %s600_s4 = inlined_call_operand.vmem [shape: f32[2,1,4,2], index: 4, kind: output, shape index: {}]  }
   0x1   :  { %s550_s17 = smov 0  }
   0x2 LB: > { %s26_s18 = sadd.s32 1, %s512_s16  ;;  %p458_p0 = scmp.ge.s32.totalorder %s516_s17, 1  ;;  %s516_s17 = sphi %s550_s17, %s14_s17   ;;  %s512_s16 = sphi %s548_s16, %s602_s16   ;;  %s508_s15 = sphi %s546_s15, %s601_s15  }
   0x3   : > { %p28_p1 = scmp.ge.s32.totalorder %s26_s18, 2  ;;  %p208_p2 = scmp.lt.s32.totalorder %s516_s17, 3 }
   0x5   : > { %s604_s18 = smov (%p28_p1, %s26_s18), 0  ;;  %p209_p3 = pnand %p458_p0, %p208_p2 }
   0x6   : > { %p252_p4 = scmp.lt.s32.totalorder (!%p209_p3), %s508_s15, 1  ;;  %s518_s26 = smov (!%p209_p3), 1  }
   0x7   : > { %212 = sbr.rel (%p209_p3) target bundleno = 392 (0x188), region = 36  ;;  %s519_s27 = smov (!%p209_p3), 15  }
   0x8   : > { %s520_s28 = smov (!%p209_p3), 127  }
   0xc   : > { %s606_s15 = smov (!%p252_p4, %s508_s15), 1  ;;  %vm305_vm3 = vcmask 7168   ;;  %vm309_vm4 = vcmask 1043456   ;;  %vm300_vm5 = vcmask 121856   ;;  %v311_v15 = vld [vmem:[%s599_s3] sm:$0xf] }
   0xd   : > { %s564_s19 = sshll.u32 %s606_s15, 2  ;;  %vm312_vm6 = vcmask 97280   ;;  %vm339_vm7 = vcmask 125952   ;;  %vm348_vm8 = vcmask 11264  }
   0xe   : > { %s258_s22 = scalar_lea.vmem %s596_s0, %s564_s19  ;;  %s272_s25 = scalar_lea.vmem %s598_s2, %s564_s19 }
   0xf   : > { %v280_v0 = vld [vmem:[%s258_s22] sm:$0xf]  ;;  %s265_s5 = scalar_lea.vmem %s597_s1, %s564_s19  ;;  %s279_s10 = scalar_lea.vmem %s600_s4, %s564_s19 }
  0x10   : > { %v288_v1 = vld [vmem:[%s272_s25] sm:$0xf]  ;;  %vm281_vm0 = vcmp.ge.f32.partialorder %v280_v0, 0.0  ;;  %v282_v2 = vmul.f32 0.02, %v280_v0 }
  0x11   : > { %vm289_vm1 = vcmp.ge.f32.partialorder %v288_v1, 0.0  ;;  %v290_v3 = vmul.f32 0.02, %v288_v1  ;;  %v284_v6 = vld [vmem:[%s265_s5] sm:$0xf] }
  0x12   : > { %v283_v4 = vsel %vm281_vm0, %v280_v0, %v282_v2  ;;  %v286_v7 = vmul.f32 0.02, %v284_v6  ;;  %vm285_vm2 = vcmp.ge.f32.partialorder %v284_v6, 0.0 }
  0x13   : > { %v291_v5 = vsel %vm289_vm1, %v288_v1, %v290_v3  ;;  %302 = vrot.lane.b32.xlu0 %v283_v4, %s518_s26  ;;  %v307_v11 = vrot.slane %v283_v4, 4 }
  0x14   : > { %297 = vrot.lane.b32.xlu1 %v291_v5, %s519_s27  ;;  %v287_v8 = vsel %vm285_vm2, %v284_v6, %v286_v7 }
  0x1b   : > { %293 = vrot.lane.b32.xlu0 %v283_v4, %s520_s28 }
  0x85   : > { %v303_v9 = vpop.permute.xlu0 %302 }
  0x86   : > { %v306_v10 = vsel %vm305_vm3, %v287_v8, %v303_v9  ;;  %v298_v12 = vpop.permute.xlu1 %297 }
  0x87   : > { %463 = vmatpush.msk.msra.mxu0 %vm309_vm4, %v306_v10 }
  0x8d   : > { %v294_v13 = vpop.permute.xlu0 %293 }
  0x8e   : > { %v301_v14 = vsel %vm300_vm5, %v294_v13, %v298_v12 }
  0x8f   : > { %v310_v16 = vsel %vm309_vm4, %v301_v14, %v307_v11 }
  0x90   : > { %334 = vmatpush.msra.mxu0 %v310_v16 }
  0x91   : > { %464 = vmatmul.msk.f32.vlgmr.msra.gmra.mxu0 %vm312_vm6, %v311_v15 }
 0x10e   : > { %v336_v17 = vpop.f32.mrf.mxu0 }
 0x10f   : > { %v343_v18 = vmul.f32 %v336_v17, %v336_v17  ;;  %v340_v19 = vsel %vm339_vm7, %v336_v17, 0.0 }
 0x110   : > { %341 = vadd.xlane.f32.xlu1 %v340_v19 }
 0x111   : > { %v344_v20 = vsel %vm339_vm7, %v343_v18, 0.0 }
 0x112   : > { %345 = vadd.xlane.f32.xlu2 %v344_v20 }
 0x183   : > { %v342_v21 = vpop.xlane.xlu1 %341 }
 0x185   : > { %v346_v22 = vpop.xlane.xlu2 %345 }
 0x186   : > { %v347_v23 = vsel %vm305_vm3, %v342_v21, %v346_v22 }
 0x187   : > { %349 = vst.msk [vmem:[%s279_s10] sm:$0xf] %vm348_vm8, %v347_v23 }
 0x188 PF: > { %s14_s17 = sadd.s32 1, %s516_s17   ;;  %s601_s15 = smov %s512_s16 }
 0x189   : > { %p11_p5 = scmp.ge.s32.totalorder %s14_s17, 4   ;;  %s602_s16 = smov %s604_s18 }
 0x18b   :  { %13 = sbr.rel (!%p11_p5) target bundleno = 2 (0x2), region = 72 }

// kernel: res_block_deconv_part.3
= control target key start
LH: loop header
LB: loop body
LE: loop exit
PB: predicated region body
PF: predicated region fallthrough
CT: control target
= control target key end

     0   :  { %11 = vsyncpa [#allocation3], 0  ;;  %s829_s0 = inlined_call_operand.vmem [shape: f32[2,4,16], index: 0, kind: input, shape index: {}]   ;;  %s830_s1 = inlined_call_operand.vmem [shape: f32[2,1,4,1], index: 1, kind: input, shape index: {}, may-alias: {1,2}]   ;;  %s831_s2 = inlined_call_operand.vmem [shape: f32[2,1,4,1], index: 2, kind: input, shape index: {}, may-alias: {1,2}]   ;;  %s832_s3 = inlined_call_operand.vmem [shape: f32[4,12], index: 3, kind: input, shape index: {}]   ;;  %s833_s4 = inlined_call_operand.vmem [shape: f32[4,1], index: 4, kind: input, shape index: {}]   ;;  %s834_s5 = inlined_call_operand.vmem [shape: f32[4,1], index: 5, kind: input, shape index: {}]   ;;  %s835_s6 = inlined_call_operand.hbm [shape: f32[2,4,16], index: 6, kind: output, shape index: {}]  }
   0x1   :  { %13 = vsyncpa [#allocation3 + $0x1], 0  ;;  %s717_s21 = smov 0   ;;  %s719_s22 = smov 0  }
   0x2   :  { %s721_s23 = smov 0   ;;  %s723_s24 = smov 0  }
   0x3   :  { %s725_s25 = smov 0   ;;  %s727_s26 = smov 0  }
   0x4 LB: > { %s521_s27 = sadd.s32 4294967295, %s676_s26   ;;  %s522_s28 = sadd.s32 4294967294, %s676_s26   ;;  %s676_s26 = sphi %s727_s26, %s19_s26   ;;  %s672_s25 = sphi %s725_s25, %s842_s25   ;;  %s668_s24 = sphi %s723_s24, %s841_s24   ;;  %s664_s23 = sphi %s721_s23, %s840_s23   ;;  %s660_s22 = sphi %s719_s22, %s839_s22   ;;  %s656_s21 = sphi %s717_s21, %s838_s21  }
   0x5   : > { %s31_s29 = sadd.s32 1, %s672_s25  ;;  %s187_s30 = sadd.s32 1, %s664_s23 }
   0x6   : > { %p33_p0 = scmp.ge.s32.totalorder %s31_s29, 2  ;;  %p197_p1 = scmp.ne.s32.totalorder %s664_s23, %s660_s22 }
   0x7   : > { %p198_p2 = scmp.eq.s32.totalorder %s521_s27, 1  ;;  %p203_p3 = scmp.ne.s32.totalorder %s660_s22, %s656_s21 }
   0x8   : > { %s844_s29 = smov (%p33_p0, %s31_s29), 0  ;;  %p204_p5 = scmp.eq.s32.totalorder %s522_s28, 1 }
   0x9   : > { %p757_p4 = por %p198_p2, %p197_p1  ;;  %s182_s8 = ssub.s32 %s672_s25, %s844_s29 }
   0xa   : > { %p525_p6 = scmp.ge.s32.totalorder %s676_s26, 1  ;;  %p185_p7 = scmp.eq.s32.totalorder %s182_s8, 0 }
   0xb   : > { %p764_p8 = por %p204_p5, %p203_p3  ;;  %p261_p9 = scmp.lt.s32.totalorder %s676_s26, 3 }
   0xc   : > { %s770_s10 = scalar_select %p185_p7, %s664_s23, %s187_s30  }
   0xd   : > { %p262_p10 = pnand %p525_p6, %p261_p9 }
   0xe   : > { %p307_p11 = scmp.lt.s32.totalorder (!%p262_p10), %s668_s24, 1  ;;  %s678_s19 = smov (!%p262_p10), 1  }
   0xf   : > { %265 = sbr.rel (%p262_p10) target bundleno = 287 (0x11f), region = 44  ;;  %s679_s20 = smov (!%p262_p10), 15  }
  0x10   : > { %s680_s27 = smov (!%p262_p10), 127   ;;  %s618_s17 = scalar_lea.hbm (!%p262_p10), %s835_s6, 8 }
  0x14   : > { %s308_s11 = scalar_select %p307_p11, %s668_s24, 1  ;;  %v387_v6 = vld [vmem:[%s833_s4] sm:$0xf]  ;;  %v681_v8 = vmov 0   ;;  %vm353_vm3 = vcmask 7168   ;;  %vm357_vm4 = vcmask 1043456  }
  0x15   : > { %v394_v7 = vld [vmem:[%s834_s5] sm:$0xf]  ;;  %595 = vset.pattern.permute.xlu1 %v681_v8  ;;  %596 = vset.pattern.permute.xlu2 %v681_v8  ;;  %vm348_vm5 = vcmask 121856   ;;  %vm360_vm6 = vcmask 97280   ;;  %vm401_vm7 = vcmask 125952  }
  0x16   : > { %s527_s12 = sshll.u32 %s308_s11, 2  ;;  %397 = vperm.xlu2 %596, %v394_v7   ;;  %597 = vset.pattern.permute.xlu0 %v681_v8  ;;  %v359_v18 = vld [vmem:[%s832_s3] sm:$0xf] }
  0x17   : > { %s313_s15 = scalar_lea.vmem %s829_s0, %s527_s12  ;;  %s327_s18 = scalar_lea.vmem %s831_s2, %s527_s12 }
  0x18   : > { %v328_v0 = vld [vmem:[%s313_s15] sm:$0xf]  ;;  %s320_s15 = scalar_lea.vmem %s830_s1, %s527_s12  ;;  %s304_s12 = sand.u32 1, %s660_s22  }
  0x19   : > { %v336_v1 = vld [vmem:[%s327_s18] sm:$0xf]  ;;  %vm329_vm0 = vcmp.ge.f32.partialorder %v328_v0, 0.0  ;;  %v330_v2 = vmul.f32 0.02, %v328_v0  ;;  %s526_s18 = sshll.u32 %s304_s12, 2 }
  0x1a   : > { %vm337_vm1 = vcmp.ge.f32.partialorder %v336_v1, 0.0  ;;  %v338_v3 = vmul.f32 0.02, %v336_v1  ;;  %v332_v9 = vld [vmem:[%s320_s15] sm:$0xf]  ;;  %s306_s30 = scalar_lea.vmem [#allocation2], %s526_s18 }
  0x1b   : > { %v331_v4 = vsel %vm329_vm0, %v328_v0, %v330_v2  ;;  %v334_v10 = vmul.f32 0.02, %v332_v9  ;;  %vm333_vm2 = vcmp.ge.f32.partialorder %v332_v9, 0.0  ;;  %s417_s8 = sshll.u32 %s306_s30, 4  ;;  %s404_s13 = scalar_lea.sflag [#allocation3], %s304_s12  ;;  %s418_s8 = int_to_ptr.vmem [resolvable:$true] %s417_s8 }
  0x1c   : > { %v339_v5 = vsel %vm337_vm1, %v336_v1, %v338_v3  ;;  %350 = vrot.lane.b32.xlu0 %v331_v4, %s678_s19  ;;  %v355_v14 = vrot.slane %v331_v4, 4  ;;  %s533_s19 = sshll.u32 %s668_s24, 2 }
  0x1d   : > { %345 = vrot.lane.b32.xlu1 %v339_v5, %s679_s20  ;;  %v335_v11 = vsel %vm333_vm2, %v332_v9, %v334_v10  ;;  %s415_s28 = scalar_lea.hbm %s835_s6, %s533_s19 }
  0x1e   : > { %s419_s11 = sshll.u32 %s415_s28, 4  ;;  %s420_s11 = int_to_ptr.hbm [resolvable:$true] %s419_s11 }
  0x1f   : > { %s612_s14 = sshra.s32 %s420_s11, 4  ;;  %s613_s14 = int_to_ptr.hbm [resolvable:$true] %s612_s14 }
  0x20   : > { %s614_s24 = scalar_lea.hbm %s613_s14, 4  ;;  %p619_p1 = scmp.lt.s32.totalorder %s613_s14, %s835_s6 }
  0x21   : > { %p615_p12 = scmp.ne.s32.totalorder %s613_s14, %s614_s24  ;;  %p620_p2 = scmp.lt.s32.totalorder %s618_s17, %s614_s24 }
  0x23   : > { %p616_p13 = pnand %p615_p12, %p757_p4  ;;  %p621_p3 = por %p620_p2, %p619_p1 }
  0x24   : > { %341 = vrot.lane.b32.xlu0 %v331_v4, %s680_s27 }
  0x25   : > { %390 = vperm.xlu1 %595, %v387_v6   ;;  %p617_p0 = pneg %p616_p13 }
  0x27   : > { %p622_p5 = pnand %p621_p3, %p617_p0 }
  0x70   : > { %v398_v22 = vpop.permute.xlu2 %397 }
  0x8e   : > { %v351_v12 = vpop.permute.xlu0 %350 }
  0x8f   : > { %v354_v13 = vsel %vm353_vm3, %v335_v11, %v351_v12  ;;  %v346_v15 = vpop.permute.xlu1 %345 }
  0x90   : > { %530 = vmatpush.msk.msra.mxu0 %vm357_vm4, %v354_v13 }
  0x96   : > { %v342_v16 = vpop.permute.xlu0 %341 }
  0x97   : > { %v349_v17 = vsel %vm348_vm5, %v342_v16, %v346_v15  ;;  %v391_v20 = vpop.permute.xlu1 %390 }
  0x98   : > { %v358_v19 = vsel %vm357_vm4, %v349_v17, %v355_v14 }
  0x99   : > { %382 = vmatpush.msra.mxu0 %v358_v19 }
  0x9a   : > { %531 = vmatmul.msk.f32.vlgmr.msra.gmra.mxu0 %vm360_vm6, %v359_v18 }
 0x117   : > { %v384_v21 = vpop.f32.mrf.mxu0 }
 0x118   : > { %v393_v23 = vmul.f32 %v391_v20, %v384_v21 }
 0x11a   : > { %v400_v24 = vadd.f32 %v398_v22, %v393_v23 }
 0x11c   : > { %402 = vst.msk [vmem:[%s306_s30] sm:$0xf] %vm401_vm7, %v400_v24 }
 0x11d   : > { %625 = shalt.err (!%p622_p5)
}
 0x11e   : > { %536 = dma.vmem_to_hbm [thread:$0]  (%p757_p4), %s418_s8, 64, %s420_s11, %s404_s13  }
 0x11f PF: > { %p542_p6 = scmp.ge.s32.totalorder %s676_s26, 2  ;;  %s431_s12 = sand.u32 1, %s656_s21  }
 0x120   : > { %s432_s20 = scalar_lea.sflag [#allocation3], %s431_s12 }
 0x121   : > { %p539_p7 = pnand %p542_p6, %p764_p8 }
 0x123   : > { %p540_p9 = pneg %p539_p7 }
 0x125   : > { %651 = dma.done.wait (%p540_p9), %s432_s20, 64  }
 0x126   : > { %653 = vsyncadd (%p540_p9), %s432_s20, 4294967232  ;;  %s19_s26 = sadd.s32 1, %s676_s26   ;;  %s838_s21 = smov %s660_s22 }
 0x127   : > { %p16_p10 = scmp.ge.s32.totalorder %s19_s26, 4   ;;  %s839_s22 = smov %s664_s23 }
 0x128   : > { %s840_s23 = smov %s770_s10  ;;  %s841_s24 = smov %s672_s25 }
 0x129   : > { %s842_s25 = smov %s844_s29  ;;  %18 = sbr.rel (!%p16_p10) target bundleno = 4 (0x4), region = 85 }
 0x12e   :  { %438 = vsyncpa [#allocation3], 1 }
 0x12f   :  { %440 = vsyncpa [#allocation3 + $0x1], 1 }

</bundles_post_ra>
